<compile_context>
chip_gen: v7x
topology: tpu7x:2x2x1
jax: 0.10.0
libtpu: 0.0.40
codegen_flags: <defaults>
</compile_context>

<pallas_src>
import functools

import jax
import jax.numpy as jnp
import numpy as np
from jax.experimental import pallas as pl
from jax.experimental.pallas import tpu as pltpu

_SUBLANE = 8  # TPU sublane width (second-to-last dim of a vreg)


def _round_up(x, m):
    return ((x + m - 1) // m) * m


def _linear_kernel(x_ref, w_ref, b_ref, o_ref, *, compute_dtype):
    # x_ref: (TM, in_dim), w_ref: (in_dim, emb_dim), b_ref: (1, emb_dim)
    x = x_ref[...]
    w = w_ref[...]
    # In-kernel cast to the MXU operand dtype (no extra HBM pass in the wrapper).
    if x.dtype != compute_dtype:
        x = x.astype(compute_dtype)
    if w.dtype != compute_dtype:
        w = w.astype(compute_dtype)
    acc = jnp.dot(x, w, preferred_element_type=jnp.float32)  # f32 MXU accumulate
    o_ref[...] = (acc + b_ref[...]).astype(o_ref.dtype)       # f32 bias add, then cast


def edge_encoder_forward(x, w_t, b, *, tile_m=1024, compute_dtype=None,
                         out_dtype=jnp.float32, core_parallel=False):
    """y = x @ w_t + b via a Pallas TPU kernel (EdgeEncoder Linear branch).

    x:   (N, in_dim)         edge features (any float dtype; not copied/cast in wrapper)
    w_t: (in_dim, emb_dim)   transpose of PyTorch Linear.weight
    b:   (emb_dim,)          Linear bias
    compute_dtype: MXU operand dtype (None -> use x.dtype as-is; jnp.bfloat16 works
                   on v5e/v6e/v7x MXUs; accumulation stays f32 either way).
    out_dtype:     output dtype (f32 = exact nn.Linear semantics; bf16 halves the
                   dominant output-writeback HBM term for bf16 downstreams).
    """
    n, in_dim = x.shape
    emb_dim = w_t.shape[1]
    if compute_dtype is None:
        compute_dtype = x.dtype

    # --- tiling ---------------------------------------------------------------
    # Large row tiles amortize per-step overhead; shrink for tiny inputs so a
    # handful of edges isn't blown up to 1024 rows.  Must stay a multiple of 8
    # (sublane) since it generally won't equal the full (ragged) row count.
    tile_m = max(_SUBLANE, min(tile_m, _round_up(n, _SUBLANE)))
    grid = (pl.cdiv(n, tile_m),)  # ragged last block: OOB output rows are dropped

    # Bias as a (1, emb_dim) f32 row; tiny, resident in VMEM across the grid.
    bp = b.astype(jnp.float32).reshape(1, emb_dim)

    x_bytes = np.dtype(x.dtype).itemsize
    w_bytes = np.dtype(w_t.dtype).itemsize
    o_bytes = np.dtype(out_dtype).itemsize
    cost = pl.CostEstimate(
        flops=2 * n * in_dim * emb_dim,
        transcendentals=0,
        bytes_accessed=(n * in_dim * x_bytes          # x read
                        + in_dim * emb_dim * w_bytes  # weight (read once)
                        + emb_dim * 4                 # bias
                        + n * emb_dim * o_bytes),     # output writeback (dominant)
    )

    # v7x: CORE_PARALLEL shards the row-grid axis across the 2 TensorCores
    # (plain "parallel" is a near no-op there); keep >=2 grid steps for it to help.
    dim_sem = (pltpu.CORE_PARALLEL,) if core_parallel else ("parallel",)

    kernel = functools.partial(_linear_kernel, compute_dtype=compute_dtype)

    y = pl.pallas_call(
        kernel,
        out_shape=jax.ShapeDtypeStruct((n, emb_dim), out_dtype),
        grid_spec=pltpu.PrefetchScalarGridSpec(
            num_scalar_prefetch=0,
            grid=grid,
            in_specs=[
                # x row tile; last dim = full in_dim (legal full-array-dim block).
                pl.BlockSpec((tile_m, in_dim), lambda i: (i, 0)),
                # Weight/bias index_maps are constant across the grid -> DMA'd
                # once, resident in VMEM.
                pl.BlockSpec((in_dim, emb_dim), lambda i: (0, 0)),
                pl.BlockSpec((1, emb_dim), lambda i: (0, 0)),
            ],
            # Full emb_dim block: no lane padding, no output slice; the ragged
            # last row-block is masked by Pallas.
            out_specs=pl.BlockSpec((tile_m, emb_dim), lambda i: (i, 0)),
        ),
        compiler_params=pltpu.CompilerParams(
            dimension_semantics=dim_sem,
            # Per-step VMEM (double-buffered x/out tiles + resident weight/bias)
            # is a few MiB at tile_m=1024 with small emb_dim -> well under the
            # v5e 16 MiB scoped default and v6e/v7x 32 MiB; no explicit
            # vmem_limit_bytes.  On v5e, back off tile_m before raising it.
        ),
        cost_estimate=cost,
    )(x, w_t, bp)

    return y


if __name__ == "__main__":
    # Small shapes consistent with EdgeEncoder's Linear branch: a ragged edge
    # count, a small edge-feature dim, emb_dim=32.
    num_edges, in_dim, emb_dim = 13, 7, 32

    key = jax.random.PRNGKey(0)
    kx, kw, kb = jax.random.split(key, 3)

    # Deterministic init mirroring nn.Linear's uniform(-1/sqrt(in), 1/sqrt(in)).
    bound = 1.0 / np.sqrt(in_dim)
    w = jax.random.uniform(kw, (emb_dim, in_dim), jnp.float32, -bound, bound)  # PyTorch layout
    b = jax.random.uniform(kb, (emb_dim,), jnp.float32, -bound, bound)
    w_t = w.T  # (in_dim, emb_dim) for the kernel

    x = jax.random.normal(kx, (num_edges, in_dim), jnp.float32)
    y_ref = x @ w_t + b  # plain-JAX reference == PyTorch nn.Linear semantics

    # f32 path: exact nn.Linear numerics (default compute/out dtypes).
    y_f32 = jax.block_until_ready(edge_encoder_forward(x, w_t, b))
    np.testing.assert_allclose(np.asarray(y_f32), np.asarray(y_ref), rtol=1e-5, atol=1e-5)

    # Force a multi-step grid with a ragged last block (13 rows, tile_m=8 -> 2 steps).
    y_rag = jax.block_until_ready(edge_encoder_forward(x, w_t, b, tile_m=8))
    np.testing.assert_allclose(np.asarray(y_rag), np.asarray(y_ref), rtol=1e-5, atol=1e-5)

    # bf16 MXU operands via in-kernel cast + bf16 output (f32 accumulate/bias inside).
    # NOTE: differs from exact nn.Linear numerics (bf16 operands/output) -> loose tol.
    y_bf16 = jax.block_until_ready(
        edge_encoder_forward(x, w_t, b, compute_dtype=jnp.bfloat16, out_dtype=jnp.bfloat16))
    np.testing.assert_allclose(np.asarray(y_bf16).astype(np.float32), np.asarray(y_ref),
                               rtol=2e-2, atol=2e-2)

    print("KERNEL_OK")
</pallas_src>

<mosaic_0001>
module attributes {stable_mosaic.version = 11 : i64} {
  func.func @_linear_kernel(%arg0: i32, %arg1: memref<16x7xf32, #tpu.memory_space<vmem>>, %arg2: memref<7x32xf32, #tpu.memory_space<vmem>>, %arg3: memref<1x32xf32, #tpu.memory_space<vmem>>, %arg4: memref<16x32xf32, #tpu.memory_space<vmem>>) attributes {dimension_semantics = [#tpu.dimension_semantics<parallel>], iteration_bounds = array<i64: 1>, scalar_prefetch = 0 : i64, scratch_operands = 0 : i64, tpu.core_type = #tpu.core_type<tc>, window_params = [{transform_indices = @transform_0, window_bounds = array<i64: 16, 7>}, {pipeline_mode = #tpu.pipeline_mode<synchronous>, transform_indices = @transform_1, window_bounds = array<i64: 7, 32>}, {pipeline_mode = #tpu.pipeline_mode<synchronous>, transform_indices = @transform_2, window_bounds = array<i64: 1, 32>}, {transform_indices = @transform_3, window_bounds = array<i64: 16, 32>}]} {
    %c0 = arith.constant 0 : index
    %c0_0 = arith.constant 0 : index
    %0 = vector.load %arg1[%c0, %c0_0] : memref<16x7xf32, #tpu.memory_space<vmem>>, vector<16x7xf32>
    %c0_1 = arith.constant 0 : index
    %c0_2 = arith.constant 0 : index
    %1 = vector.load %arg2[%c0_1, %c0_2] : memref<7x32xf32, #tpu.memory_space<vmem>>, vector<7x32xf32>
    %cst = arith.constant dense<0.000000e+00> : vector<16x32xf32>
    %2 = tpu.matmul %0, %1, %cst {dimension_numbers = #tpu.dot_dimension_numbers<[1], [0], [0], [1], [0, 0, 1, 1], [], []>} : vector<16x7xf32>, vector<7x32xf32>, vector<16x32xf32> -> vector<16x32xf32>
    %c0_3 = arith.constant 0 : index
    %c0_4 = arith.constant 0 : index
    %3 = vector.load %arg3[%c0_3, %c0_4] : memref<1x32xf32, #tpu.memory_space<vmem>>, vector<1x32xf32>
    %4 = vector.broadcast %3 : vector<1x32xf32> to vector<16x32xf32>
    %5 = arith.addf %2, %4 : vector<16x32xf32>
    %c0_5 = arith.constant 0 : index
    %c0_6 = arith.constant 0 : index
    %6 = vector.load %arg4[%c0_5, %c0_6] : memref<16x32xf32, #tpu.memory_space<vmem>>, vector<16x32xf32>
    tpu.vector_store %arg4[%c0_5, %c0_6], %5 {strides = array<i32>} : memref<16x32xf32, #tpu.memory_space<vmem>>, vector<16x32xf32>,
    return
  }
  func.func @transform_0(%arg0: i32) -> (i32, i32) {
    %c0_i32 = arith.constant 0 : i32
    %c0_i32_0 = arith.constant 0 : i32
    return %arg0, %c0_i32 : i32, i32
  }
  func.func @transform_1(%arg0: i32) -> (i32, i32) {
    %c0_i32 = arith.constant 0 : i32
    %c0_i32_0 = arith.constant 0 : i32
    %c0_i32_1 = arith.constant 0 : i32
    return %c0_i32, %c0_i32_0 : i32, i32
  }
  func.func @transform_2(%arg0: i32) -> (i32, i32) {
    %c0_i32 = arith.constant 0 : i32
    %c0_i32_0 = arith.constant 0 : i32
    %c0_i32_1 = arith.constant 0 : i32
    return %c0_i32, %c0_i32_0 : i32, i32
  }
  func.func @transform_3(%arg0: i32) -> (i32, i32) {
    %c0_i32 = arith.constant 0 : i32
    %c0_i32_0 = arith.constant 0 : i32
    return %arg0, %c0_i32 : i32, i32
  }
}

</mosaic_0001>

<bundles_post_ra>
// kernel: tpu_custom_call.1
= control target key start
LH: loop header
LB: loop body
LE: loop exit
PB: predicated region body
PF: predicated region fallthrough
CT: control target
= control target key end

     0   :  { %vm32_vm0 = vcmask 1046528   ;;  %vm25_vm1 = vcmask 56320   ;;  %s216_s0 = inlined_call_operand.vmem [shape: f32[13,7], index: 0, kind: input, shape index: {}]   ;;  %s217_s1 = inlined_call_operand.vmem [shape: f32[7,32], index: 1, kind: input, shape index: {}]   ;;  %s218_s2 = inlined_call_operand.vmem [shape: f32[1,32], index: 2, kind: input, shape index: {}]   ;;  %s219_s3 = inlined_call_operand.hbm [shape: f32[13,32], index: 3, kind: output, shape index: {}]  }
   0x1   :  { %v17_v0 = vld [vmem:[%s217_s1] sm:$0x7f]  ;;  %v16_v2 = vld [vmem:[%s216_s0 + $0x8] sm:$0xff] }
   0x2   :  { %v15_v1 = vld [vmem:[%s216_s0] sm:$0xff]  ;;  %137 = vmatprep.subr.msk.mxu0 %vm32_vm0, %v17_v0 }
   0x3   :  { %139 = vmatprep.mubr.msk.f32.mxu0 %vm25_vm1, %v15_v1 }
   0x4   :  { %8 = vsyncpa [#allocation3], 0  ;;  %138 = vmatpush3.msk.msra.mxu0 %vm32_vm0, %v17_v0  ;;  %v130_v3 = vld [vmem:[%s218_s2] ss:$0 sm:$0xff]  ;;  %s169_s1 = smov [#allocation2]   ;;  %vm111_vm2 = vcmask 261120  }
   0x5   :  { %140 = vmatmul.mubr.msk.f32.vlgmr.msra.gmra.mrb[0].mxu0 %vm25_vm1, %v16_v2  ;;  %s119_s20 = sshll.u32 %s169_s1, 4  ;;  %s120_s20 = int_to_ptr.vmem [resolvable:$true] %s119_s20 }
   0x6   :  { %s145_s0 = scalar_lea.vmem %s120_s20, 256  ;;  %p150_p1 = scmp.lt.s32.totalorder %s120_s20, %s120_s20 }
   0x7   :  { %p146_p0 = scmp.ne.s32.totalorder %s120_s20, %s145_s0  ;;  %p151_p2 = scmp.lt.s32.totalorder %s145_s0, %s145_s0 }
   0x9   :  { %p152_p3 = por %p151_p2, %p150_p1 }
   0xb   :  { %p153_p4 = pnand %p152_p3, %p146_p0 }
  0xd8   :  { %v141_v4 = vpop.f32.mrb[0].mxu0 }
  0xd9   :  { %v108_v5 = vadd.f32 %v141_v4, %v130_v3  ;;  %v102_v6 = vpop.f32.mrb[1].mxu0 }
  0xda   :  { %v103_v7 = vadd.f32 %v130_v3, %v102_v6 }
  0xdb   :  { %113 = vst.msk [vmem:[#allocation2 + $0x8] sm:$0xff] %vm111_vm2, %v108_v5 }
  0xdc   :  { %112 = vst.msk [vmem:[#allocation2] sm:$0xff] %vm111_vm2, %v103_v7 }
  0xdd   :  { %156 = shalt.err (!%p153_p4)
}
  0xde   :  { %s157_s2 = scalar_lea.hbm %s219_s3, 256 }
  0xdf   :  { %p158_p5 = scmp.ne.s32.totalorder %s219_s3, %s157_s2  ;;  %p161_p6 = scmp.lt.u32.totalorder %s157_s2, %s219_s3 }
  0xe1   :  { %p163_p7 = pnand %p161_p6, %p158_p5 }
  0xe3   :  { %166 = shalt.err (!%p163_p7)
}
  0xe4   :  { %s170_s27 = smov 128   ;;  %s171_s28 = smov 8  }
  0xe5   :  { %125 = dma.vmem_to_hbm [thread:$0]  %s120_s20, 256, %s219_s3, [#allocation3], %s170_s27, %s170_s27, %s171_s28  }
  0xe6   :  { %167 = dma.done.wait [#allocation3], 256  }
  0xe7   :  { %168 = vsyncadd [#allocation3], 4294967040 }
  0xe8   :  { %129 = vsyncpa [#allocation3], 1 }

</bundles_post_ra>
